<compile_context>
chip_gen: v6e
topology: v6e:2x2x1
jax: 0.10.0
libtpu: 0.0.40
codegen_flags: <defaults>
</compile_context>

<pallas_src>
import jax
import jax.numpy as jnp
from jax import lax
from jax.experimental import pallas as pl
from jax.experimental.pallas import tpu as pltpu


def _vmem_capacity_bytes():
    """Physical VMEM per core; conservative 64 MiB (v7x) fallback."""
    try:
        info = pltpu.get_tpu_info()
        cap = getattr(info, "vmem_capacity_bytes", None)
        if cap:
            return int(cap)
    except Exception:
        pass
    return 64 << 20


def _plan(total, itemsizes, block_target_bytes, vmem_cap):
    """Pick (lanes, rows, sub, TM, S, K, vmem_limit) or None for jnp fallback."""
    lanes = None
    for cand in (512, 256, 128):
        if total % cand == 0:
            lanes = cand
            break
    if lanes is None:
        return None                      # cannot form a copy-free 2-D view
    rows = total // lanes
    # sublane slab height: 8 for f32, 16 for bf16/f16, 32 for 8-bit inputs
    sub = max(8, 32 // min(itemsizes))
    if rows < sub:
        return None                      # too small to be worth a kernel launch

    sum_item = sum(itemsizes)            # bytes/element streamed across all inputs
    max_item = max(itemsizes)

    # VMEM budget: leave headroom below physical capacity, cap at ~100 MiB.
    budget = max(min(vmem_cap - (8 << 20), 100 << 20), 24 << 20)
    cap_tgt = block_target_bytes // (lanes * max_item)           # per-input target
    cap_vmem = (budget - (2 << 20)) // (2 * lanes * sum_item)     # double-buffered
    cap_rows = max(sub, min(cap_tgt, cap_vmem) // sub * sub)

    S = 2 if rows >= 2 * sub else 1      # 2 "parallel" splits -> both TCs on v7x
    n = max(S, -(-rows // cap_rows))     # desired number of blocks (ceil)
    n = -(-n // S) * S                   # multiple of S so both splits get equal K
    tm = max(sub, min(rows // n, cap_rows) // sub * sub)
    n = min(n, rows // tm)               # only full blocks; rest -> jnp suffix
    n = (n // S) * S
    K = n // S

    vmem_limit = min(max(2 * tm * lanes * sum_item + (8 << 20), 32 << 20),
                     vmem_cap - (4 << 20))
    return lanes, rows, sub, tm, S, K, int(vmem_limit)


def _make_dice_kernel(n_slabs, sub, masked):
    """Kernel over one (TM, lanes) block with TM == n_slabs * sub rows."""

    def kernel(*refs):
        if masked:
            p_ref, t_ref, m_ref, a_ref, s_ref = refs
        else:
            p_ref, t_ref, a_ref, s_ref = refs

        # First K-step of this split: zero the resident accumulators.
        @pl.when(pl.program_id(1) == 0)
        def _():
            a_ref[...] = jnp.zeros_like(a_ref)
            s_ref[...] = jnp.zeros_like(s_ref)

        def body(i, carry):
            acc_a, acc_s = carry
            r0 = pl.multiple_of(i * sub, sub)
            # f32 upcast in-kernel keeps bf16 bit-exact vs. the reference;
            # plenty of VALU slack at HBM-roofline on v5e/v6e.
            p = p_ref[pl.ds(r0, sub), :].astype(jnp.float32)
            t = t_ref[pl.ds(r0, sub), :].astype(jnp.float32)
            if masked:
                m = m_ref[pl.ds(r0, sub), :].astype(jnp.float32)
                p = p * m
                t = t * m
            return acc_a + p * t, acc_s + (p + t)   # sum(p)+sum(t) fused

        zeros = jnp.zeros(a_ref.shape, jnp.float32)
        unroll = 4 if n_slabs >= 4 else n_slabs
        acc_a, acc_s = lax.fori_loop(0, n_slabs, body, (zeros, zeros),
                                     unroll=unroll)
        a_ref[...] += acc_a
        s_ref[...] += acc_s

    return kernel


def _jnp_partial_sums(flats, masked):
    p = flats[0].astype(jnp.float32)
    t = flats[1].astype(jnp.float32)
    if masked:
        m = flats[2].astype(jnp.float32)
        p = p * m
        t = t * m
    return jnp.sum(p * t), jnp.sum(p) + jnp.sum(t)


def dice_loss(pred, target, mask=None, eps=1e-6,
              block_target_bytes=8 * 1024 * 1024):
    masked = mask is not None
    xs = [pred, target] + ([mask] if masked else [])
    total = 1
    for d in pred.shape:
        total *= int(d)
    itemsizes = [jnp.dtype(x.dtype).itemsize for x in xs]
    flats = [x.reshape(-1) for x in xs]          # free bitcast view

    plan = _plan(total, itemsizes, block_target_bytes, _vmem_capacity_bytes())
    if plan is None:
        # TODO(synk): element counts not divisible by 128 (or tiny inputs)
        # cannot be 2-D-viewed without an HBM copy; use one fused XLA reduction
        # instead (still reads every element exactly once).
        a, bc = _jnp_partial_sums(flats, masked)
        return 1.0 - 2.0 * a / (bc + eps)

    lanes, rows, sub, tm, S, K, vmem_limit = plan
    covered_rows = S * K * tm
    covered = covered_rows * lanes

    views = [f.reshape(rows, lanes) for f in flats]   # exact, free reshape
    kernel = _make_dice_kernel(tm // sub, sub, masked)

    in_specs = [pl.BlockSpec((tm, lanes), lambda s, k: (s * K + k, 0))
                for _ in views]
    out_specs = tuple(pl.BlockSpec((None, sub, lanes), lambda s, k: (s, 0, 0))
                      for _ in range(2))

    out_a, out_s = pl.pallas_call(
        kernel,
        out_shape=(jax.ShapeDtypeStruct((S, sub, lanes), jnp.float32),
                   jax.ShapeDtypeStruct((S, sub, lanes), jnp.float32)),
        grid_spec=pltpu.PrefetchScalarGridSpec(
            num_scalar_prefetch=0,
            grid=(S, K),
            in_specs=in_specs,
            out_specs=out_specs,
        ),
        compiler_params=pltpu.CompilerParams(
            dimension_semantics=("parallel", "arbitrary"),
            vmem_limit_bytes=vmem_limit,
        ),
    )(*views)

    a = jnp.sum(out_a)     # sum(p * t)
    bc = jnp.sum(out_s)    # sum(p) + sum(t)

    if covered < total:
        # Small uncovered suffix (< one block): suffix-slice cost scales with
        # the tail size, not the full array.
        ta, tbc = _jnp_partial_sums([f[covered:] for f in flats], masked)
        a = a + ta
        bc = bc + tbc

    return 1.0 - 2.0 * a / (bc + eps)


def dice_loss_ref(pred, target, mask=None, eps=1e-6):
    """Pure-JAX reference mirroring the PyTorch forward."""
    B = pred.shape[0]
    p = pred.reshape(B, -1).astype(jnp.float32)
    t = target.reshape(B, -1).astype(jnp.float32)
    if mask is not None:
        m = mask.reshape(B, -1).astype(jnp.float32)
        p = p * m
        t = t * m
    a = jnp.sum(p * t)
    b = jnp.sum(p)
    c = jnp.sum(t)
    return 1.0 - 2.0 * a / (b + c + eps)


if __name__ == "__main__":
    key = jax.random.PRNGKey(0)
    k1, k2, k3, k4, k5 = jax.random.split(key, 5)

    B, C, H, W = 2, 4, 32, 32  # 8192 elements -> (16, 512) view, grid (2, 1)
    pred = jax.nn.sigmoid(jax.random.normal(k1, (B, C, H, W), jnp.float32))
    target = (jax.random.uniform(k2, (B, C, H, W)) > 0.5).astype(jnp.float32)
    mask = (jax.random.uniform(k3, (B, C, H, W)) > 0.2).astype(jnp.float32)

    # 1) masked, f32
    loss = jax.block_until_ready(dice_loss(pred, target, mask))
    ref = dice_loss_ref(pred, target, mask)
    assert jnp.allclose(loss, ref, atol=1e-5, rtol=1e-5), (loss, ref)

    # 2) no mask (specialized 2-input kernel, no ones-mask stream)
    loss2 = jax.block_until_ready(dice_loss(pred, target, None))
    ref2 = dice_loss_ref(pred, target, None)
    assert jnp.allclose(loss2, ref2, atol=1e-5, rtol=1e-5), (loss2, ref2)

    # 3) native bf16 pred/target with f32 mask (16-row slabs, f32 accumulation)
    loss3 = jax.block_until_ready(
        dice_loss(pred.astype(jnp.bfloat16), target.astype(jnp.bfloat16), mask))
    ref3 = dice_loss_ref(pred.astype(jnp.bfloat16), target.astype(jnp.bfloat16), mask)
    assert jnp.allclose(loss3, ref3, atol=1e-4, rtol=1e-4), (loss3, ref3)

    # 4) element count not divisible by 128 (2*3*50*50 = 15000): copy-free
    #    single-pass jnp fallback path.
    pred4 = jax.nn.sigmoid(jax.random.normal(k4, (2, 3, 50, 50), jnp.float32))
    target4 = (jax.random.uniform(k5, (2, 3, 50, 50)) > 0.5).astype(jnp.float32)
    loss4 = jax.block_until_ready(dice_loss(pred4, target4, None))
    ref4 = dice_loss_ref(pred4, target4, None)
    assert jnp.allclose(loss4, ref4, atol=1e-5, rtol=1e-5), (loss4, ref4)

    # 5) multi-step (parallel, arbitrary) grid + uncovered-row suffix:
    #    102400 elements = 200 rows of 512; tiny blocks force grid (2, 12)
    #    covering 192 rows, last 8 rows folded in with jnp.
    k6, k7 = jax.random.split(k4)
    pred5 = jax.nn.sigmoid(jax.random.normal(k6, (2, 4, 100, 128), jnp.float32))
    target5 = (jax.random.uniform(k7, (2, 4, 100, 128)) > 0.5).astype(jnp.float32)
    loss5 = jax.block_until_ready(
        dice_loss(pred5, target5, None, block_target_bytes=16 * 1024))
    ref5 = dice_loss_ref(pred5, target5, None)
    assert jnp.allclose(loss5, ref5, atol=1e-5, rtol=1e-5), (loss5, ref5)

    print("KERNEL_OK")
</pallas_src>

<mosaic_0001>
module attributes {stable_mosaic.version = 11 : i64} {
  func.func @kernel(%arg0: i32, %arg1: i32, %arg2: memref<8x512xf32, #tpu.memory_space<vmem>>, %arg3: memref<8x512xf32, #tpu.memory_space<vmem>>, %arg4: memref<8x512xf32, #tpu.memory_space<vmem>>, %arg5: memref<1x8x512xf32, #tpu.memory_space<vmem>>, %arg6: memref<1x8x512xf32, #tpu.memory_space<vmem>>) attributes {dimension_semantics = [#tpu.dimension_semantics<parallel>, #tpu.dimension_semantics<arbitrary>], iteration_bounds = array<i64: 2, 1>, scalar_prefetch = 0 : i64, scratch_operands = 0 : i64, tpu.core_type = #tpu.core_type<tc>, window_params = [{transform_indices = @transform_0, window_bounds = array<i64: 8, 512>}, {transform_indices = @transform_1, window_bounds = array<i64: 8, 512>}, {transform_indices = @transform_2, window_bounds = array<i64: 8, 512>}, {transform_indices = @transform_3, window_bounds = array<i64: 1, 8, 512>}, {transform_indices = @transform_4, window_bounds = array<i64: 1, 8, 512>}]} {
    %c0_i32 = arith.constant 0 : i32
    %0 = arith.cmpi eq, %arg1, %c0_i32 : i32
    %1 = arith.extui %0 : i1 to i32
    %c0_i32_0 = arith.constant 0 : i32
    %2 = arith.cmpi ne, %1, %c0_i32_0 : i32
    scf.if %2 {
      %cst_16 = arith.constant 0.000000e+00 : f32
      %30 = vector.broadcast %cst_16 : f32 to vector<8x512xf32>
      %c0_17 = arith.constant 0 : index
      %c0_18 = arith.constant 0 : index
      %c0_19 = arith.constant 0 : index
      %31 = vector.load %arg5[%c0_17, %c0_18, %c0_19] : memref<1x8x512xf32, #tpu.memory_space<vmem>>, vector<1x8x512xf32>
      %32 = vector.shape_cast %31 : vector<1x8x512xf32> to vector<8x512xf32>
      %33 = vector.shape_cast %30 : vector<8x512xf32> to vector<1x8x512xf32>
      tpu.vector_store %arg5[%c0_17, %c0_18, %c0_19], %33 {strides = array<i32>} : memref<1x8x512xf32, #tpu.memory_space<vmem>>, vector<1x8x512xf32>,
      %cst_20 = arith.constant 0.000000e+00 : f32
      %34 = vector.broadcast %cst_20 : f32 to vector<8x512xf32>
      %c0_21 = arith.constant 0 : index
      %c0_22 = arith.constant 0 : index
      %c0_23 = arith.constant 0 : index
      %35 = vector.load %arg6[%c0_21, %c0_22, %c0_23] : memref<1x8x512xf32, #tpu.memory_space<vmem>>, vector<1x8x512xf32>
      %36 = vector.shape_cast %35 : vector<1x8x512xf32> to vector<8x512xf32>
      %37 = vector.shape_cast %34 : vector<8x512xf32> to vector<1x8x512xf32>
      tpu.vector_store %arg6[%c0_21, %c0_22, %c0_23], %37 {strides = array<i32>} : memref<1x8x512xf32, #tpu.memory_space<vmem>>, vector<1x8x512xf32>,
    } else {
    }
    %cst = arith.constant 0.000000e+00 : f32
    %3 = vector.broadcast %cst : f32 to vector<8x512xf32>
    %c0_i32_1 = arith.constant 0 : i32
    %c8_i32 = arith.constant 8 : i32
    %4 = arith.muli %c0_i32_1, %c8_i32 : i32
    %5 = tpu.assume_multiple %4, 8 : i32
    %6 = arith.index_cast %5 : i32 to index
    %c0 = arith.constant 0 : index
    %7 = vector.load %arg2[%6, %c0] : memref<8x512xf32, #tpu.memory_space<vmem>>, vector<8x512xf32>
    %8 = arith.index_cast %5 : i32 to index
    %c0_2 = arith.constant 0 : index
    %9 = vector.load %arg3[%8, %c0_2] : memref<8x512xf32, #tpu.memory_space<vmem>>, vector<8x512xf32>
    %10 = arith.index_cast %5 : i32 to index
    %c0_3 = arith.constant 0 : index
    %11 = vector.load %arg4[%10, %c0_3] : memref<8x512xf32, #tpu.memory_space<vmem>>, vector<8x512xf32>
    %12 = arith.mulf %7, %11 : vector<8x512xf32>
    %13 = arith.mulf %9, %11 : vector<8x512xf32>
    %14 = arith.mulf %12, %13 : vector<8x512xf32>
    %15 = arith.addf %3, %14 : vector<8x512xf32>
    %16 = arith.addf %12, %13 : vector<8x512xf32>
    %17 = arith.addf %3, %16 : vector<8x512xf32>
    %c1_i32 = arith.constant 1 : i32
    %c0_4 = arith.constant 0 : index
    %c0_5 = arith.constant 0 : index
    %c0_6 = arith.constant 0 : index
    %18 = vector.load %arg5[%c0_4, %c0_5, %c0_6] : memref<1x8x512xf32, #tpu.memory_space<vmem>>, vector<1x8x512xf32>
    %19 = vector.shape_cast %18 : vector<1x8x512xf32> to vector<8x512xf32>
    %20 = arith.addf %19, %15 : vector<8x512xf32>
    %c0_7 = arith.constant 0 : index
    %c0_8 = arith.constant 0 : index
    %c0_9 = arith.constant 0 : index
    %21 = vector.load %arg5[%c0_7, %c0_8, %c0_9] : memref<1x8x512xf32, #tpu.memory_space<vmem>>, vector<1x8x512xf32>
    %22 = vector.shape_cast %21 : vector<1x8x512xf32> to vector<8x512xf32>
    %23 = vector.shape_cast %20 : vector<8x512xf32> to vector<1x8x512xf32>
    tpu.vector_store %arg5[%c0_7, %c0_8, %c0_9], %23 {strides = array<i32>} : memref<1x8x512xf32, #tpu.memory_space<vmem>>, vector<1x8x512xf32>,
    %c0_10 = arith.constant 0 : index
    %c0_11 = arith.constant 0 : index
    %c0_12 = arith.constant 0 : index
    %24 = vector.load %arg6[%c0_10, %c0_11, %c0_12] : memref<1x8x512xf32, #tpu.memory_space<vmem>>, vector<1x8x512xf32>
    %25 = vector.shape_cast %24 : vector<1x8x512xf32> to vector<8x512xf32>
    %26 = arith.addf %25, %17 : vector<8x512xf32>
    %c0_13 = arith.constant 0 : index
    %c0_14 = arith.constant 0 : index
    %c0_15 = arith.constant 0 : index
    %27 = vector.load %arg6[%c0_13, %c0_14, %c0_15] : memref<1x8x512xf32, #tpu.memory_space<vmem>>, vector<1x8x512xf32>
    %28 = vector.shape_cast %27 : vector<1x8x512xf32> to vector<8x512xf32>
    %29 = vector.shape_cast %26 : vector<8x512xf32> to vector<1x8x512xf32>
    tpu.vector_store %arg6[%c0_13, %c0_14, %c0_15], %29 {strides = array<i32>} : memref<1x8x512xf32, #tpu.memory_space<vmem>>, vector<1x8x512xf32>,
    return
  }
  func.func @transform_0(%arg0: i32, %arg1: i32) -> (i32, i32) {
    %c1_i32 = arith.constant 1 : i32
    %0 = arith.muli %arg0, %c1_i32 : i32
    %1 = arith.addi %0, %arg1 : i32
    %c0_i32 = arith.constant 0 : i32
    %c0_i32_0 = arith.constant 0 : i32
    return %1, %c0_i32 : i32, i32
  }
  func.func @transform_1(%arg0: i32, %arg1: i32) -> (i32, i32) {
    %c1_i32 = arith.constant 1 : i32
    %0 = arith.muli %arg0, %c1_i32 : i32
    %1 = arith.addi %0, %arg1 : i32
    %c0_i32 = arith.constant 0 : i32
    %c0_i32_0 = arith.constant 0 : i32
    return %1, %c0_i32 : i32, i32
  }
  func.func @transform_2(%arg0: i32, %arg1: i32) -> (i32, i32) {
    %c1_i32 = arith.constant 1 : i32
    %0 = arith.muli %arg0, %c1_i32 : i32
    %1 = arith.addi %0, %arg1 : i32
    %c0_i32 = arith.constant 0 : i32
    %c0_i32_0 = arith.constant 0 : i32
    return %1, %c0_i32 : i32, i32
  }
  func.func @transform_3(%arg0: i32, %arg1: i32) -> (i32, i32, i32) {
    %c0_i32 = arith.constant 0 : i32
    %c0_i32_0 = arith.constant 0 : i32
    %c0_i32_1 = arith.constant 0 : i32
    return %arg0, %c0_i32, %c0_i32_0 : i32, i32, i32
  }
  func.func @transform_4(%arg0: i32, %arg1: i32) -> (i32, i32, i32) {
    %c0_i32 = arith.constant 0 : i32
    %c0_i32_0 = arith.constant 0 : i32
    %c0_i32_1 = arith.constant 0 : i32
    return %arg0, %c0_i32, %c0_i32_0 : i32, i32, i32
  }
}

</mosaic_0001>

<bundles_post_ra>
// kernel: tpu_custom_call.1
= control target key start
LH: loop header
LB: loop body
LE: loop exit
PB: predicated region body
PF: predicated region fallthrough
CT: control target
= control target key end

     0   :  { %s1170_s0 = inlined_call_operand.hbm [shape: f32[16,512], index: 0, kind: input, shape index: {}]   ;;  %s1171_s1 = inlined_call_operand.hbm [shape: f32[16,512], index: 1, kind: input, shape index: {}]   ;;  %s1172_s2 = inlined_call_operand.hbm [shape: f32[16,512], index: 2, kind: input, shape index: {}]   ;;  %s1173_s3 = inlined_call_operand.hbm [shape: f32[2,8,512], index: 3, kind: output, shape index: {0}]   ;;  %s1174_s4 = inlined_call_operand.hbm [shape: f32[2,8,512], index: 4, kind: output, shape index: {1}]  }
   0x1   :  { %1178 = sst [smem:[#allocation18_spill]] %s1171_s1 }
   0x2   :  { %10 = vsyncpa [#allocation3], 0 }
   0x3   :  { %12 = vsyncpa [#allocation3 + $0x1], 0 }
   0x4   :  { %13 = vsyncpa [#allocation6], 0 }
   0x5   :  { %15 = vsyncpa [#allocation6 + $0x1], 0 }
   0x6   :  { %16 = vsyncpa [#allocation4], 0 }
   0x7   :  { %18 = vsyncpa [#allocation4 + $0x1], 0 }
   0x8   :  { %19 = vsyncpa [#allocation10], 0 }
   0x9   :  { %21 = vsyncpa [#allocation10 + $0x1], 0  ;;  %s931_s15 = smov 0   ;;  %s933_s16 = smov 0  }
   0xa   :  { %s935_s17 = smov 0   ;;  %s937_s18 = smov 0  }
   0xb   :  { %s939_s19 = smov 0   ;;  %s941_s20 = smov 0  }
   0xc LB: > { %1179 = sst [smem:[#allocation15_spill]] %s895_s19  ;;  %s962_s21 = sadd.s32 4294967295, %s899_s20   ;;  %s899_s20 = sphi %s941_s20, %s27_s20   ;;  %s895_s19 = sphi %s939_s19, %s1193_s19   ;;  %s891_s18 = sphi %s937_s18, %s1192_s18   ;;  %s887_s17 = sphi %s935_s17, %s1196_s17   ;;  %s883_s16 = sphi %s933_s16, %s1195_s16   ;;  %s879_s15 = sphi %s931_s15, %s1194_s15  }
   0xd   : > { %s592_s22 = sadd.s32 4294967294, %s899_s20   ;;  %s39_s23 = sadd.s32 1, %s895_s19 }
   0xe   : > { %s48_s24 = sadd.s32 1, %s887_s17  ;;  %p41_p0 = scmp.ge.s32.totalorder %s39_s23, 2 }
   0xf   : > { %p55_p1 = scmp.ne.s32.totalorder %s887_s17, %s883_s16  ;;  %p56_p2 = scmp.eq.s32.totalorder %s899_s20, 0 }
  0x10   : > { %p61_p3 = scmp.ne.s32.totalorder %s883_s16, %s879_s15  ;;  %s1198_s23 = smov (%p41_p0, %s39_s23), 0 }
  0x11   : > { %1180 = sst [smem:[#allocation16_spill]] %s1198_s23  ;;  %p974_p4 = por %p56_p2, %p55_p1 }
  0x12   : > { %p62_p5 = scmp.eq.s32.totalorder %s962_s21, 0  ;;  %s45_s26 = ssub.s32 %s895_s19, %s1198_s23 }
  0x13   : > { %p141_p6 = scmp.eq.s32.totalorder %s962_s21, 1  ;;  %p46_p7 = scmp.eq.s32.totalorder %s45_s26, 0 }
  0x14   : > { %p982_p8 = por %p62_p5, %p61_p3  ;;  %p147_p10 = scmp.eq.s32.totalorder %s592_s22, 1 }
  0x15   : > { %p986_p9 = por %p141_p6, %p55_p1  ;;  %p650_p13 = scmp.lt.s32.totalorder %s899_s20, 2 }
  0x16   : > { %s991_s29 = scalar_select %p46_p7, %s887_s17, %s48_s24  }
  0x17   : > { %p993_p11 = por %p147_p10, %p61_p3  ;;  %s1175_s5 = sand.u32 1, %s887_s17  }
  0x18   : > { %1184 = sst [smem:[#allocation17_spill]] %s991_s29  ;;  %s1002_s6 = sshll.u32 %s1175_s5, 5 }
  0x19   : > { %s1005_s7 = sshll.u32 %s895_s19, 9  ;;  %p1009_p0 = pnand %p650_p13, %p974_p4 }
  0x1a   : > { %s213_s9 = sand.u32 1, %s899_s20   ;;  %s1187_s1 = sld [smem:[#allocation18_spill]] }
  0x1b   : > { %s217_s13 = scalar_lea.vmem [#allocation5], %s1002_s6  ;;  %p604_p1 = scmp.ge.s32.totalorder %s899_s20, 1 }
  0x1c   : > { %s226_s14 = sshll.u32 %s217_s13, 4  ;;  %p251_p2 = scmp.lt.s32.totalorder %s899_s20, 3  ;;  %s227_s14 = int_to_ptr.vmem [resolvable:$true] %s226_s14 }
  0x1d   : > { %s1021_s22 = scalar_lea.sflag [#allocation6], %s213_s9  ;;  %p703_p3 = pneg %p1009_p0 }
  0x1e   : > { %s714_s24 = scalar_lea.vmem %s227_s14, 512  ;;  %s901_s25 = smov [#allocation5]  }
  0x1f   : > { %p715_p4 = scmp.ne.s32.totalorder %s227_s14, %s714_s24  ;;  %s719_s26 = sshll.u32 %s901_s25, 4  ;;  %s720_s26 = int_to_ptr.vmem [resolvable:$false] %s719_s26 }
  0x20   : > { %s224_s12 = scalar_lea.hbm %s1187_s1, %s1005_s7  ;;  %s721_s10 = scalar_lea.vmem %s720_s26, 1024 }
  0x21   : > { %p717_p5 = pnand %p715_p4, %p703_p3  ;;  %p722_p7 = scmp.lt.s32.totalorder %s227_s14, %s720_s26 }
  0x22   : > { %p723_p10 = scmp.lt.s32.totalorder %s721_s10, %s714_s24 }
  0x23   : > { %p718_p6 = pneg %p717_p5 }
  0x24   : > { %p724_p13 = por %p723_p10, %p722_p7 }
  0x26   : > { %p725_p12 = pnand %p724_p13, %p718_p6 }
  0x28   : > { %728 = shalt.err (!%p725_p12)
}
  0x29   : > { %639 = dma.hbm_to_vmem [thread:$0]  (!%p1009_p0), %s224_s12, 512, %s227_s14, %s1021_s22  }
  0x2a   : > { %p1035_p4 = pnand %p604_p1, %p251_p2  ;;  %s204_s24 = scalar_lea.hbm %s1170_s0, %s1005_s7 }
  0x2b   : > { %s197_s25 = scalar_lea.vmem [#allocation2], %s1002_s6  ;;  %s244_s1 = scalar_lea.hbm %s1172_s2, %s1005_s7 }
  0x2c   : > { %s206_s26 = sshll.u32 %s197_s25, 4  ;;  %s1189_s23 = sand.u32 1, %s887_s17   ;;  %s207_s26 = int_to_ptr.vmem [resolvable:$true] %s206_s26 }
  0x2d   : > { %s194_s19 = scalar_lea.sflag [#allocation3], %s1189_s23  ;;  %s742_s12 = scalar_lea.vmem %s207_s26, 512 }
  0x2e   : > { %p743_p12 = scmp.ne.s32.totalorder %s207_s26, %s742_s12  ;;  %s902_s14 = smov [#allocation2]  }
  0x2f   : > { %s747_s29 = sshll.u32 %s902_s14, 4  ;;  %s748_s29 = int_to_ptr.vmem [resolvable:$false] %s747_s29 }
  0x30   : > { %p745_p1 = pnand %p743_p12, %p703_p3  ;;  %s749_s11 = scalar_lea.vmem %s748_s29, 1024 }
  0x31   : > { %p750_p5 = scmp.lt.s32.totalorder %s207_s26, %s748_s29  ;;  %p751_p6 = scmp.lt.s32.totalorder %s749_s11, %s742_s12 }
  0x32   : > { %p746_p2 = pneg %p745_p1 }
  0x33   : > { %p752_p7 = por %p751_p6, %p750_p5 }
  0x35   : > { %p753_p10 = pnand %p752_p7, %p746_p2 }
  0x37   : > { %756 = shalt.err (!%p753_p10)
}
  0x38   : > { %636 = dma.hbm_to_vmem [thread:$0]  (!%p1009_p0), %s204_s24, 512, %s207_s26, %s194_s19  }
  0x39   : > { %s237_s23 = scalar_lea.vmem [#allocation7], %s1002_s6  ;;  %s903_s25 = smov [#allocation7]  }
  0x3a   : > { %s246_s5 = sshll.u32 %s237_s23, 4  ;;  %s775_s29 = sshll.u32 %s903_s25, 4  ;;  %s247_s5 = int_to_ptr.vmem [resolvable:$true] %s246_s5  ;;  %s776_s29 = int_to_ptr.vmem [resolvable:$false] %s775_s29 }
  0x3b   : > { %s770_s13 = scalar_lea.vmem %s247_s5, 512  ;;  %s777_s10 = scalar_lea.vmem %s776_s29, 1024 }
  0x3c   : > { %p771_p13 = scmp.ne.s32.totalorder %s247_s5, %s770_s13  ;;  %p778_p2 = scmp.lt.s32.totalorder %s247_s5, %s776_s29 }
  0x3d   : > { %p779_p5 = scmp.lt.s32.totalorder %s777_s10, %s770_s13 }
  0x3e   : > { %p773_p12 = pnand %p771_p13, %p703_p3 }
  0x3f   : > { %p780_p6 = por %p779_p5, %p778_p2 }
  0x40   : > { %p774_p1 = pneg %p773_p12 }
  0x42   : > { %p781_p7 = pnand %p780_p6, %p774_p1 }
  0x44   : > { %784 = shalt.err (!%p781_p7)
}
  0x45   : > { %642 = dma.hbm_to_vmem [thread:$0]  (!%p1009_p0), %s244_s1, 512, %s247_s5, %s1021_s22  }
  0x46   : > { %255 = sbr.rel (%p1035_p4) target bundleno = 127 (0x7f), region = 32  ;;  %s1070_s24 = sand.u32 (!%p1035_p4), 1, %s883_s16  }
  0x47   : > { %s1073_s26 = sshll.u32 (!%p1035_p4), %s1070_s24, 5  ;;  %s258_s8 = scalar_lea.sflag (!%p1035_p4), [#allocation3], %s1070_s24 }
  0x48   : > { %s261_s12 = scalar_lea.vmem (!%p1035_p4), [#allocation2], %s1073_s26 }
  0x4b   : > { %862 = dma.done.wait (%p982_p8), %s258_s8, 512  }
  0x4c   : > { %864 = vsyncadd (%p982_p8), %s258_s8, 4294966784  ;;  %s266_s1 = sand.u32 1, %s962_s21   ;;  %s270_s22 = scalar_lea.vmem [#allocation5], %s1073_s26 }
  0x4d   : > { %s267_s7 = scalar_lea.sflag [#allocation6], %s266_s1 }
  0x4e   : > { %866 = dma.done.wait (%p982_p8), %s267_s7, 1024  }
  0x4f   : > { %868 = vsyncadd (%p982_p8), %s267_s7, 4294966272  ;;  %v337_v0 = vld [vmem:[%s261_s12] sm:$0xff]  ;;  %s279_s9 = scalar_lea.vmem [#allocation7], %s1073_s26  ;;  %v338_v5 = vld [vmem:[%s261_s12 + $0x8] sm:$0xff]  ;;  %s621_s21 = sshll.u32 %s891_s18, 9 }
  0x50   : > { %v343_v1 = vld [vmem:[%s270_s22] sm:$0xff]  ;;  %v344_v6 = vld [vmem:[%s270_s22 + $0x8] sm:$0xff]  ;;  %v339_v10 = vld [vmem:[%s261_s12 + $0x10] sm:$0xff]  ;;  %s311_s27 = scalar_lea.vmem [#allocation8], %s1073_s26  ;;  %s318_s11 = scalar_lea.vmem [#allocation9], %s1073_s26 }
  0x51   : > { %v349_v2 = vld [vmem:[%s279_s9] sm:$0xff]  ;;  %v350_v7 = vld [vmem:[%s279_s9 + $0x8] sm:$0xff]  ;;  %v345_v11 = vld [vmem:[%s270_s22 + $0x10] sm:$0xff]  ;;  %s421_s14 = sshll.u32 %s311_s27, 4  ;;  %s435_s23 = sshll.u32 %s318_s11, 4  ;;  %s1096_s14 = int_to_ptr.vmem [resolvable:$true] %s421_s14  ;;  %s1103_s23 = int_to_ptr.vmem [resolvable:$true] %s435_s23 }
  0x52   : > { %v353_v3 = vmul.f32 %v349_v2, %v337_v0  ;;  %v357_v4 = vmul.f32 %v349_v2, %v343_v1  ;;  %v354_v8 = vmul.f32 %v350_v7, %v338_v5  ;;  %v358_v9 = vmul.f32 %v350_v7, %v344_v6  ;;  %v351_v12 = vld [vmem:[%s279_s9 + $0x10] sm:$0xff]  ;;  %v340_v16 = vld [vmem:[%s261_s12 + $0x18] sm:$0xff]  ;;  %s1094_s25 = scalar_lea.hbm %s1173_s3, %s621_s21  ;;  %s1101_s10 = scalar_lea.hbm %s1174_s4, %s621_s21 }
  0x53   : > { %v355_v14 = vmul.f32 %v351_v12, %v339_v10  ;;  %v359_v15 = vmul.f32 %v351_v12, %v345_v11  ;;  %v346_v17 = vld [vmem:[%s270_s22 + $0x18] sm:$0xff]  ;;  %s402_s19 = scalar_lea.sflag [#allocation4], %s1070_s24  ;;  %s785_s6 = scalar_lea.vmem %s1096_s14, 512 }
  0x54   : > { %v361_v13 = vmul.f32 %v357_v4, %v353_v3  ;;  %v352_v18 = vld [vmem:[%s279_s9 + $0x18] sm:$0xff]  ;;  %v369_v19 = vadd.f32 %v357_v4, %v353_v3  ;;  %v362_v20 = vmul.f32 %v358_v9, %v354_v8  ;;  %v370_v23 = vadd.f32 %v358_v9, %v354_v8  ;;  %p786_p8 = scmp.ne.s32.totalorder %s1096_s14, %s785_s6  ;;  %s904_s26 = smov [#allocation8]  }
  0x55   : > { %v356_v21 = vmul.f32 %v352_v18, %v340_v16  ;;  %v360_v22 = vmul.f32 %v352_v18, %v346_v17  ;;  %v363_v24 = vmul.f32 %v359_v15, %v355_v14  ;;  %v371_v25 = vadd.f32 %v359_v15, %v355_v14  ;;  %s789_s8 = sshll.u32 %s904_s26, 4  ;;  %s790_s8 = int_to_ptr.vmem [resolvable:$false] %s789_s8 }
  0x56   : > { %385 = vst [vmem:[%s311_s27] sm:$0xff] %v361_v13  ;;  %397 = vst [vmem:[%s318_s11] sm:$0xff] %v369_v19  ;;  %p787_p0 = pnand %p786_p8, %p986_p9  ;;  %s791_s12 = scalar_lea.vmem %s790_s8, 1024 }
  0x57   : > { %v364_v26 = vmul.f32 %v360_v22, %v356_v21  ;;  %v372_v27 = vadd.f32 %v360_v22, %v356_v21  ;;  %386 = vst [vmem:[%s311_s27 + $0x8] sm:$0xff] %v362_v20  ;;  %398 = vst [vmem:[%s318_s11 + $0x8] sm:$0xff] %v370_v23  ;;  %p792_p4 = scmp.lt.s32.totalorder %s1096_s14, %s790_s8  ;;  %p793_p10 = scmp.lt.s32.totalorder %s791_s12, %s785_s6 }
  0x58   : > { %387 = vst [vmem:[%s311_s27 + $0x10] sm:$0xff] %v363_v24  ;;  %399 = vst [vmem:[%s318_s11 + $0x10] sm:$0xff] %v371_v25  ;;  %p788_p3 = pneg %p787_p0 }
  0x59   : > { %388 = vst [vmem:[%s311_s27 + $0x18] sm:$0xff] %v364_v26  ;;  %400 = vst [vmem:[%s318_s11 + $0x18] sm:$0xff] %v372_v27  ;;  %p794_p13 = por %p793_p10, %p792_p4 }
  0x5b   : > { %p795_p12 = pnand %p794_p13, %p788_p3 }
  0x5d   : > { %798 = shalt.err (!%p795_p12)
}
  0x5e   : > { %s799_s1 = scalar_lea.hbm %s1094_s25, 512  ;;  %s803_s9 = scalar_lea.hbm %s1173_s3, 1024 }
  0x5f   : > { %p800_p1 = scmp.ne.s32.totalorder %s1094_s25, %s799_s1  ;;  %p804_p6 = scmp.lt.s32.totalorder %s1094_s25, %s1173_s3 }
  0x60   : > { %p805_p7 = scmp.lt.s32.totalorder %s803_s9, %s799_s1 }
  0x61   : > { %p801_p2 = pnand %p800_p1, %p986_p9 }
  0x62   : > { %p806_p8 = por %p805_p7, %p804_p6 }
  0x63   : > { %p802_p5 = pneg %p801_p2 }
  0x65   : > { %p807_p0 = pnand %p806_p8, %p802_p5 }
  0x67   : > { %810 = shalt.err (!%p807_p0)
}
  0x68   : > { %629 = dma.vmem_to_hbm [thread:$0]  (%p986_p9), %s1096_s14, 512, %s1094_s25, %s402_s19  }
  0x69   : > { %s407_s11 = scalar_lea.sflag [#allocation10], %s1070_s24  ;;  %s811_s5 = scalar_lea.vmem %s1103_s23, 512 }
  0x6a   : > { %p812_p3 = scmp.ne.s32.totalorder %s1103_s23, %s811_s5  ;;  %s905_s13 = smov [#allocation9]  }
  0x6b   : > { %s815_s18 = sshll.u32 %s905_s13, 4  ;;  %s816_s18 = int_to_ptr.vmem [resolvable:$false] %s815_s18 }
  0x6c   : > { %p813_p4 = pnand %p812_p3, %p986_p9  ;;  %s817_s29 = scalar_lea.vmem %s816_s18, 1024 }
  0x6d   : > { %p818_p13 = scmp.lt.s32.totalorder %s1103_s23, %s816_s18  ;;  %p819_p12 = scmp.lt.s32.totalorder %s817_s29, %s811_s5 }
  0x6e   : > { %p814_p10 = pneg %p813_p4 }
  0x6f   : > { %p820_p1 = por %p819_p12, %p818_p13 }
  0x71   : > { %p821_p2 = pnand %p820_p1, %p814_p10 }
  0x73   : > { %824 = shalt.err (!%p821_p2)
}
  0x74   : > { %s825_s14 = scalar_lea.hbm %s1101_s10, 512  ;;  %s829_s19 = scalar_lea.hbm %s1174_s4, 1024 }
  0x75   : > { %p826_p5 = scmp.ne.s32.totalorder %s1101_s10, %s825_s14  ;;  %p830_p8 = scmp.lt.s32.totalorder %s1101_s10, %s1174_s4 }
  0x76   : > { %p831_p0 = scmp.lt.s32.totalorder %s829_s19, %s825_s14 }
  0x77   : > { %p827_p6 = pnand %p826_p5, %p986_p9 }
  0x78   : > { %p832_p3 = por %p831_p0, %p830_p8 }
  0x79   : > { %p828_p7 = pneg %p827_p6 }
  0x7b   : > { %p833_p4 = pnand %p832_p3, %p828_p7 }
  0x7d   : > { %836 = shalt.err (!%p833_p4)
}
  0x7e   : > { %630 = dma.vmem_to_hbm [thread:$0]  (%p986_p9), %s1103_s23, 512, %s1101_s10, %s407_s11  }
  0x7f PF: > { %s447_s8 = sand.u32 1, %s879_s15   ;;  %p1190_p10 = scmp.ge.s32.totalorder %s899_s20, 2 }
  0x80   : > { %s448_s12 = scalar_lea.sflag [#allocation4], %s447_s8 }
  0x81   : > { %p644_p13 = pnand %p1190_p10, %p993_p11 }
  0x83   : > { %p645_p12 = pneg %p644_p13 }
  0x85   : > { %870 = dma.done.wait (%p645_p12), %s448_s12, 512  }
  0x86   : > { %872 = vsyncadd (%p645_p12), %s448_s12, 4294966784  ;;  %s457_s1 = scalar_lea.sflag [#allocation10], %s447_s8 }
  0x87   : > { %874 = dma.done.wait (%p645_p12), %s457_s1, 512  }
  0x88   : > { %876 = vsyncadd (%p645_p12), %s457_s1, 4294966784  ;;  %s27_s20 = sadd.s32 1, %s899_s20   ;;  %s1191_s28 = sld [smem:[#allocation17_spill]] }
  0x89   : > { %p24_p1 = scmp.ge.s32.totalorder %s27_s20, 4   ;;  %s1192_s18 = sld [smem:[#allocation15_spill]] }
  0x8a   : > { %s1193_s19 = sld [smem:[#allocation16_spill]]  ;;  %s1194_s15 = smov %s883_s16 }
  0x8b   : > { %s1195_s16 = smov %s887_s17  ;;  %26 = sbr.rel (!%p24_p1) target bundleno = 12 (0xc), region = 125 }
  0x8e   : > { %s1196_s17 = smov %s1191_s28 }
  0x90   :  { %462 = vsyncpa [#allocation3], 1 }
  0x91   :  { %464 = vsyncpa [#allocation3 + $0x1], 1 }
  0x92   :  { %465 = vsyncpa [#allocation6], 1 }
  0x93   :  { %467 = vsyncpa [#allocation6 + $0x1], 1 }
  0x94   :  { %468 = vsyncpa [#allocation4], 1 }
  0x95   :  { %470 = vsyncpa [#allocation4 + $0x1], 1 }
  0x96   :  { %471 = vsyncpa [#allocation10], 1 }
  0x97   :  { %473 = vsyncpa [#allocation10 + $0x1], 1 }

</bundles_post_ra>
